<compile_context>
chip_gen: v7x
topology: tpu7x:2x2x1
jax: 0.10.0
libtpu: 0.0.40
codegen_flags: <defaults>
</compile_context>

<pallas_src>
import jax
import jax.numpy as jnp
from jax.experimental import pallas as pl
from jax.experimental.pallas import tpu as pltpu

# ---- small model / problem sizes ------------------------------------------
C = 4            # latent channels of z (and of the inner-model output)
CC = 4           # channels of c_concat
C_IN = C + CC    # inner model input channels
H = W = 16       # spatial
S = 8            # crossattn sequence length
D = 32           # crossattn embedding dim
ROWS = H * W     # 256 — lane axis inside the kernel (2 x 128, dense)
KTOT = C + CC + CC  # 12 effective input channels: [z ; cond cc ; uncond cc]


def cfg_denoise_kernel(w_ref, b_ref, z_ref, ccc_ref, ccu_ref, out_ref):
    """out[C, ROWS] = W_eff @ [z ; cc_cond ; cc_uncond] + b_eff.

    w_ref  : SMEM [C*KTOT]  effective weights (sigma + CFG scales folded in),
             laid out w_ref[c*KTOT + k] with k ordered [z(0:C), ccc, ccu].
    b_ref  : SMEM [C]       combined bias (sigma*bc + CFG-combined ctx proj).
    z_ref  : VMEM [C,  ROWS]  latent, channels on sublanes / spatial on lanes.
    ccc_ref: VMEM [CC, ROWS]  cond   c_concat.
    ccu_ref: VMEM [CC, ROWS]  uncond c_concat.
    out_ref: VMEM [C,  ROWS]  lane-dense output.
    """
    z = z_ref[...]       # [C,  ROWS] f32
    ccc = ccc_ref[...]   # [CC, ROWS] f32
    ccu = ccu_ref[...]   # [CC, ROWS] f32
    for c in range(C):                          # static unroll: 4 output chans
        base = c * KTOT
        # start acc from bias + first FMA (no explicit zeros materialization)
        acc = b_ref[c] + w_ref[base] * z[0:1, :]
        for k in range(1, C):                   # remaining z contribution
            acc = acc + w_ref[base + k] * z[k:k + 1, :]
        for k in range(CC):                     # cond c_concat contribution
            acc = acc + w_ref[base + C + k] * ccc[k:k + 1, :]
        for k in range(CC):                     # uncond c_concat contribution
            acc = acc + w_ref[base + C + CC + k] * ccu[k:k + 1, :]
        out_ref[c:c + 1, :] = acc               # lane-dense row store


def cfg_denoiser(z, sigma, cond, uncond, text_cfg_scale, image_cfg_scale,
                 params):
    """z: [1, C, H, W] (NCHW, like PyTorch); sigma: [1];
    cond/uncond: dicts with 'c_crossattn' -> [[1, S, D]] and
    'c_concat' -> [[1, CC, H, W]].  Returns [1, C, H, W]."""
    wc, bc, wctx = params
    tcfg = text_cfg_scale
    icfg = image_cfg_scale
    sig = sigma[0].astype(jnp.float32)

    # --- CFG linearity folding (all tiny, O(C_IN*C)) -------------------------
    # out = out_uncond + t*(out_cond - out_img) + i*(out_img - out_uncond)
    #     = t*out_cond + (i-t)*out_img + (1-i)*out_uncond      (coeffs sum to 1)
    # with out_b = sigma*([z ; cc_b] @ wc + bc) + mean(ca_b) @ wctx and the
    # module's branch conditioning (cc: cond/cond/uncond, ca: cond/uncond/uncond):
    #   z   : total coeff 1
    #   cc  : i*cc_cond + (1-i)*cc_uncond
    #   ctx : t*ctx_cond + (1-t)*ctx_uncond
    wz = sig * wc[:C, :]                                     # [C,  C]
    wcc = wc[C:, :]                                          # [CC, C]
    w_all = jnp.concatenate(
        [wz, sig * icfg * wcc, sig * (1.0 - icfg) * wcc], axis=0)  # [KTOT, C]
    w_flat = w_all.T.reshape(-1).astype(jnp.float32)         # [C*KTOT] (SMEM)

    ctx_c = jnp.mean(cond['c_crossattn'][0][0], axis=0)      # [D]
    ctx_u = jnp.mean(uncond['c_crossattn'][0][0], axis=0)    # [D]
    ctx = tcfg * ctx_c + (1.0 - tcfg) * ctx_u                # [D]
    b_tot = (sig * bc[0] + ctx @ wctx).astype(jnp.float32)   # [C] (SMEM)

    # Channel-major, spatially-flattened views: free reshapes from NCHW
    # (no transpose, no 3x z / 2x c_concat replication in HBM).
    z_rows = z[0].reshape(C, ROWS).astype(jnp.float32)
    ccc_rows = cond['c_concat'][0][0].reshape(CC, ROWS).astype(jnp.float32)
    ccu_rows = uncond['c_concat'][0][0].reshape(CC, ROWS).astype(jnp.float32)

    out_rows = pl.pallas_call(
        cfg_denoise_kernel,
        out_shape=jax.ShapeDtypeStruct((C, ROWS), jnp.float32),
        grid_spec=pltpu.PrefetchScalarGridSpec(
            num_scalar_prefetch=0,
            grid=(1,),   # whole problem (~13 KB) in one invocation
            in_specs=[
                pl.BlockSpec(memory_space=pltpu.MemorySpace.SMEM),  # w_flat
                pl.BlockSpec(memory_space=pltpu.MemorySpace.SMEM),  # b_tot
                pl.BlockSpec((C, ROWS), lambda g: (0, 0)),          # z
                pl.BlockSpec((CC, ROWS), lambda g: (0, 0)),         # cond cc
                pl.BlockSpec((CC, ROWS), lambda g: (0, 0)),         # uncond cc
            ],
            out_specs=pl.BlockSpec((C, ROWS), lambda g: (0, 0)),
        ),
        compiler_params=pltpu.CompilerParams(
            dimension_semantics=("arbitrary",)),
    )(w_flat, b_tot, z_rows, ccc_rows, ccu_rows)

    # rows -> NCHW (free reshape, channels already leading)
    return out_rows.reshape(1, C, H, W)


def _reference(z, sigma, cond, uncond, t_cfg, i_cfg, params):
    """Pure-JAX reference of the same (synthetic inner model + CFG) math,
    written exactly like the torch module: 3-way replication, inner model on
    all branches, chunk, guided combination."""
    wc, bc, wctx = params
    cfg_z = jnp.concatenate([z, z, z], 0)
    cfg_sigma = jnp.concatenate([sigma, sigma, sigma], 0)
    cfg_ca = jnp.concatenate([cond['c_crossattn'][0], uncond['c_crossattn'][0],
                              uncond['c_crossattn'][0]], 0)
    cfg_cc = jnp.concatenate([cond['c_concat'][0], cond['c_concat'][0],
                              uncond['c_concat'][0]], 0)
    x = jnp.concatenate([cfg_z, cfg_cc], 1).transpose(0, 2, 3, 1)  # [3,H,W,C_IN]
    h = jnp.einsum('bhwc,cd->bhwd', x, wc) + bc[0]
    ctx = jnp.mean(cfg_ca, axis=1) @ wctx                          # [3,C]
    out = h * cfg_sigma[:, None, None, None] + ctx[:, None, None, :]
    o_c, o_ic, o_uc = out[0], out[1], out[2]
    res = o_uc + t_cfg * (o_c - o_ic) + i_cfg * (o_ic - o_uc)
    return res.transpose(2, 0, 1)[None]


if __name__ == "__main__":
    key = jax.random.PRNGKey(0)
    ks = jax.random.split(key, 8)

    # deterministic synthetic "inner model" parameters
    wc = (jax.random.normal(ks[0], (C_IN, C), jnp.float32) * 0.1)
    bc = (jax.random.normal(ks[1], (1, C), jnp.float32) * 0.01)
    wctx = (jax.random.normal(ks[2], (D, C), jnp.float32) * 0.1)
    params = (wc, bc, wctx)

    # inputs (batch-1, as the torch forward expects: '1 ... -> n ...')
    z = jax.random.normal(ks[3], (1, C, H, W), jnp.float32)
    sigma = jnp.array([0.7], jnp.float32)
    cond = {
        'c_crossattn': [jax.random.normal(ks[4], (1, S, D), jnp.float32)],
        'c_concat': [jax.random.normal(ks[5], (1, CC, H, W), jnp.float32)],
    }
    uncond = {
        'c_crossattn': [jax.random.normal(ks[6], (1, S, D), jnp.float32)],
        'c_concat': [jax.random.normal(ks[7], (1, CC, H, W), jnp.float32)],
    }
    text_cfg_scale = 7.5
    image_cfg_scale = 1.5

    denoise = jax.jit(cfg_denoiser, static_argnums=(4, 5))
    out = denoise(z, sigma, cond, uncond, text_cfg_scale,
                  image_cfg_scale, params)
    out = jax.block_until_ready(out)

    ref = _reference(z, sigma, cond, uncond, text_cfg_scale,
                     image_cfg_scale, params)
    assert out.shape == (1, C, H, W)
    assert jnp.allclose(out, ref, atol=1e-4, rtol=1e-4)
    print("KERNEL_OK")
</pallas_src>

<mosaic_0001>
module attributes {stable_mosaic.version = 11 : i64} {
  func.func @cfg_denoise_kernel(%arg0: i32, %arg1: memref<48xf32, #tpu.memory_space<smem>>, %arg2: memref<4xf32, #tpu.memory_space<smem>>, %arg3: memref<4x256xf32, #tpu.memory_space<vmem>>, %arg4: memref<4x256xf32, #tpu.memory_space<vmem>>, %arg5: memref<4x256xf32, #tpu.memory_space<vmem>>, %arg6: memref<4x256xf32, #tpu.memory_space<vmem>>) attributes {dimension_semantics = [#tpu.dimension_semantics<arbitrary>], iteration_bounds = array<i64: 1>, scalar_prefetch = 0 : i64, scratch_operands = 0 : i64, tpu.core_type = #tpu.core_type<tc>, window_params = [{transform_indices = @transform_0, window_bounds = array<i64: 48>}, {transform_indices = @transform_1, window_bounds = array<i64: 4>}, {pipeline_mode = #tpu.pipeline_mode<synchronous>, transform_indices = @transform_2, window_bounds = array<i64: 4, 256>}, {pipeline_mode = #tpu.pipeline_mode<synchronous>, transform_indices = @transform_3, window_bounds = array<i64: 4, 256>}, {pipeline_mode = #tpu.pipeline_mode<synchronous>, transform_indices = @transform_4, window_bounds = array<i64: 4, 256>}, {pipeline_mode = #tpu.pipeline_mode<synchronous>, transform_indices = @transform_5, window_bounds = array<i64: 4, 256>}]} {
    %c0 = arith.constant 0 : index
    %c0_0 = arith.constant 0 : index
    %0 = vector.load %arg3[%c0, %c0_0] : memref<4x256xf32, #tpu.memory_space<vmem>>, vector<4x256xf32>
    %c0_1 = arith.constant 0 : index
    %c0_2 = arith.constant 0 : index
    %1 = vector.load %arg4[%c0_1, %c0_2] : memref<4x256xf32, #tpu.memory_space<vmem>>, vector<4x256xf32>
    %c0_3 = arith.constant 0 : index
    %c0_4 = arith.constant 0 : index
    %2 = vector.load %arg5[%c0_3, %c0_4] : memref<4x256xf32, #tpu.memory_space<vmem>>, vector<4x256xf32>
    %c0_5 = arith.constant 0 : index
    %3 = memref.load %arg2[%c0_5] : memref<4xf32, #tpu.memory_space<smem>>
    %c0_6 = arith.constant 0 : index
    %4 = memref.load %arg1[%c0_6] : memref<48xf32, #tpu.memory_space<smem>>
    %5 = vector.extract_strided_slice %0 {offsets = [0, 0], sizes = [1, 256], strides = [1, 1]} : vector<4x256xf32> to vector<1x256xf32>
    %6 = vector.broadcast %4 : f32 to vector<1x256xf32>
    %7 = arith.mulf %6, %5 : vector<1x256xf32>
    %8 = vector.broadcast %3 : f32 to vector<1x256xf32>
    %9 = arith.addf %8, %7 : vector<1x256xf32>
    %c1 = arith.constant 1 : index
    %10 = memref.load %arg1[%c1] : memref<48xf32, #tpu.memory_space<smem>>
    %11 = vector.extract_strided_slice %0 {offsets = [1, 0], sizes = [1, 256], strides = [1, 1]} : vector<4x256xf32> to vector<1x256xf32>
    %12 = vector.broadcast %10 : f32 to vector<1x256xf32>
    %13 = arith.mulf %12, %11 : vector<1x256xf32>
    %14 = arith.addf %9, %13 : vector<1x256xf32>
    %c2 = arith.constant 2 : index
    %15 = memref.load %arg1[%c2] : memref<48xf32, #tpu.memory_space<smem>>
    %16 = vector.extract_strided_slice %0 {offsets = [2, 0], sizes = [1, 256], strides = [1, 1]} : vector<4x256xf32> to vector<1x256xf32>
    %17 = vector.broadcast %15 : f32 to vector<1x256xf32>
    %18 = arith.mulf %17, %16 : vector<1x256xf32>
    %19 = arith.addf %14, %18 : vector<1x256xf32>
    %c3 = arith.constant 3 : index
    %20 = memref.load %arg1[%c3] : memref<48xf32, #tpu.memory_space<smem>>
    %21 = vector.extract_strided_slice %0 {offsets = [3, 0], sizes = [1, 256], strides = [1, 1]} : vector<4x256xf32> to vector<1x256xf32>
    %22 = vector.broadcast %20 : f32 to vector<1x256xf32>
    %23 = arith.mulf %22, %21 : vector<1x256xf32>
    %24 = arith.addf %19, %23 : vector<1x256xf32>
    %c4 = arith.constant 4 : index
    %25 = memref.load %arg1[%c4] : memref<48xf32, #tpu.memory_space<smem>>
    %26 = vector.extract_strided_slice %1 {offsets = [0, 0], sizes = [1, 256], strides = [1, 1]} : vector<4x256xf32> to vector<1x256xf32>
    %27 = vector.broadcast %25 : f32 to vector<1x256xf32>
    %28 = arith.mulf %27, %26 : vector<1x256xf32>
    %29 = arith.addf %24, %28 : vector<1x256xf32>
    %c5 = arith.constant 5 : index
    %30 = memref.load %arg1[%c5] : memref<48xf32, #tpu.memory_space<smem>>
    %31 = vector.extract_strided_slice %1 {offsets = [1, 0], sizes = [1, 256], strides = [1, 1]} : vector<4x256xf32> to vector<1x256xf32>
    %32 = vector.broadcast %30 : f32 to vector<1x256xf32>
    %33 = arith.mulf %32, %31 : vector<1x256xf32>
    %34 = arith.addf %29, %33 : vector<1x256xf32>
    %c6 = arith.constant 6 : index
    %35 = memref.load %arg1[%c6] : memref<48xf32, #tpu.memory_space<smem>>
    %36 = vector.extract_strided_slice %1 {offsets = [2, 0], sizes = [1, 256], strides = [1, 1]} : vector<4x256xf32> to vector<1x256xf32>
    %37 = vector.broadcast %35 : f32 to vector<1x256xf32>
    %38 = arith.mulf %37, %36 : vector<1x256xf32>
    %39 = arith.addf %34, %38 : vector<1x256xf32>
    %c7 = arith.constant 7 : index
    %40 = memref.load %arg1[%c7] : memref<48xf32, #tpu.memory_space<smem>>
    %41 = vector.extract_strided_slice %1 {offsets = [3, 0], sizes = [1, 256], strides = [1, 1]} : vector<4x256xf32> to vector<1x256xf32>
    %42 = vector.broadcast %40 : f32 to vector<1x256xf32>
    %43 = arith.mulf %42, %41 : vector<1x256xf32>
    %44 = arith.addf %39, %43 : vector<1x256xf32>
    %c8 = arith.constant 8 : index
    %45 = memref.load %arg1[%c8] : memref<48xf32, #tpu.memory_space<smem>>
    %46 = vector.extract_strided_slice %2 {offsets = [0, 0], sizes = [1, 256], strides = [1, 1]} : vector<4x256xf32> to vector<1x256xf32>
    %47 = vector.broadcast %45 : f32 to vector<1x256xf32>
    %48 = arith.mulf %47, %46 : vector<1x256xf32>
    %49 = arith.addf %44, %48 : vector<1x256xf32>
    %c9 = arith.constant 9 : index
    %50 = memref.load %arg1[%c9] : memref<48xf32, #tpu.memory_space<smem>>
    %51 = vector.extract_strided_slice %2 {offsets = [1, 0], sizes = [1, 256], strides = [1, 1]} : vector<4x256xf32> to vector<1x256xf32>
    %52 = vector.broadcast %50 : f32 to vector<1x256xf32>
    %53 = arith.mulf %52, %51 : vector<1x256xf32>
    %54 = arith.addf %49, %53 : vector<1x256xf32>
    %c10 = arith.constant 10 : index
    %55 = memref.load %arg1[%c10] : memref<48xf32, #tpu.memory_space<smem>>
    %56 = vector.extract_strided_slice %2 {offsets = [2, 0], sizes = [1, 256], strides = [1, 1]} : vector<4x256xf32> to vector<1x256xf32>
    %57 = vector.broadcast %55 : f32 to vector<1x256xf32>
    %58 = arith.mulf %57, %56 : vector<1x256xf32>
    %59 = arith.addf %54, %58 : vector<1x256xf32>
    %c11 = arith.constant 11 : index
    %60 = memref.load %arg1[%c11] : memref<48xf32, #tpu.memory_space<smem>>
    %61 = vector.extract_strided_slice %2 {offsets = [3, 0], sizes = [1, 256], strides = [1, 1]} : vector<4x256xf32> to vector<1x256xf32>
    %62 = vector.broadcast %60 : f32 to vector<1x256xf32>
    %63 = arith.mulf %62, %61 : vector<1x256xf32>
    %64 = arith.addf %59, %63 : vector<1x256xf32>
    %c0_7 = arith.constant 0 : index
    %c0_8 = arith.constant 0 : index
    %65 = vector.load %arg6[%c0_7, %c0_8] : memref<4x256xf32, #tpu.memory_space<vmem>>, vector<1x256xf32>
    tpu.vector_store %arg6[%c0_7, %c0_8], %64 {strides = array<i32>} : memref<4x256xf32, #tpu.memory_space<vmem>>, vector<1x256xf32>,
    %c1_9 = arith.constant 1 : index
    %66 = memref.load %arg2[%c1_9] : memref<4xf32, #tpu.memory_space<smem>>
    %c12 = arith.constant 12 : index
    %67 = memref.load %arg1[%c12] : memref<48xf32, #tpu.memory_space<smem>>
    %68 = vector.extract_strided_slice %0 {offsets = [0, 0], sizes = [1, 256], strides = [1, 1]} : vector<4x256xf32> to vector<1x256xf32>
    %69 = vector.broadcast %67 : f32 to vector<1x256xf32>
    %70 = arith.mulf %69, %68 : vector<1x256xf32>
    %71 = vector.broadcast %66 : f32 to vector<1x256xf32>
    %72 = arith.addf %71, %70 : vector<1x256xf32>
    %c13 = arith.constant 13 : index
    %73 = memref.load %arg1[%c13] : memref<48xf32, #tpu.memory_space<smem>>
    %74 = vector.extract_strided_slice %0 {offsets = [1, 0], sizes = [1, 256], strides = [1, 1]} : vector<4x256xf32> to vector<1x256xf32>
    %75 = vector.broadcast %73 : f32 to vector<1x256xf32>
    %76 = arith.mulf %75, %74 : vector<1x256xf32>
    %77 = arith.addf %72, %76 : vector<1x256xf32>
    %c14 = arith.constant 14 : index
    %78 = memref.load %arg1[%c14] : memref<48xf32, #tpu.memory_space<smem>>
    %79 = vector.extract_strided_slice %0 {offsets = [2, 0], sizes = [1, 256], strides = [1, 1]} : vector<4x256xf32> to vector<1x256xf32>
    %80 = vector.broadcast %78 : f32 to vector<1x256xf32>
    %81 = arith.mulf %80, %79 : vector<1x256xf32>
    %82 = arith.addf %77, %81 : vector<1x256xf32>
    %c15 = arith.constant 15 : index
    %83 = memref.load %arg1[%c15] : memref<48xf32, #tpu.memory_space<smem>>
    %84 = vector.extract_strided_slice %0 {offsets = [3, 0], sizes = [1, 256], strides = [1, 1]} : vector<4x256xf32> to vector<1x256xf32>
    %85 = vector.broadcast %83 : f32 to vector<1x256xf32>
    %86 = arith.mulf %85, %84 : vector<1x256xf32>
    %87 = arith.addf %82, %86 : vector<1x256xf32>
    %c16 = arith.constant 16 : index
    %88 = memref.load %arg1[%c16] : memref<48xf32, #tpu.memory_space<smem>>
    %89 = vector.extract_strided_slice %1 {offsets = [0, 0], sizes = [1, 256], strides = [1, 1]} : vector<4x256xf32> to vector<1x256xf32>
    %90 = vector.broadcast %88 : f32 to vector<1x256xf32>
    %91 = arith.mulf %90, %89 : vector<1x256xf32>
    %92 = arith.addf %87, %91 : vector<1x256xf32>
    %c17 = arith.constant 17 : index
    %93 = memref.load %arg1[%c17] : memref<48xf32, #tpu.memory_space<smem>>
    %94 = vector.extract_strided_slice %1 {offsets = [1, 0], sizes = [1, 256], strides = [1, 1]} : vector<4x256xf32> to vector<1x256xf32>
    %95 = vector.broadcast %93 : f32 to vector<1x256xf32>
    %96 = arith.mulf %95, %94 : vector<1x256xf32>
    %97 = arith.addf %92, %96 : vector<1x256xf32>
    %c18 = arith.constant 18 : index
    %98 = memref.load %arg1[%c18] : memref<48xf32, #tpu.memory_space<smem>>
    %99 = vector.extract_strided_slice %1 {offsets = [2, 0], sizes = [1, 256], strides = [1, 1]} : vector<4x256xf32> to vector<1x256xf32>
    %100 = vector.broadcast %98 : f32 to vector<1x256xf32>
    %101 = arith.mulf %100, %99 : vector<1x256xf32>
    %102 = arith.addf %97, %101 : vector<1x256xf32>
    %c19 = arith.constant 19 : index
    %103 = memref.load %arg1[%c19] : memref<48xf32, #tpu.memory_space<smem>>
    %104 = vector.extract_strided_slice %1 {offsets = [3, 0], sizes = [1, 256], strides = [1, 1]} : vector<4x256xf32> to vector<1x256xf32>
    %105 = vector.broadcast %103 : f32 to vector<1x256xf32>
    %106 = arith.mulf %105, %104 : vector<1x256xf32>
    %107 = arith.addf %102, %106 : vector<1x256xf32>
    %c20 = arith.constant 20 : index
    %108 = memref.load %arg1[%c20] : memref<48xf32, #tpu.memory_space<smem>>
    %109 = vector.extract_strided_slice %2 {offsets = [0, 0], sizes = [1, 256], strides = [1, 1]} : vector<4x256xf32> to vector<1x256xf32>
    %110 = vector.broadcast %108 : f32 to vector<1x256xf32>
    %111 = arith.mulf %110, %109 : vector<1x256xf32>
    %112 = arith.addf %107, %111 : vector<1x256xf32>
    %c21 = arith.constant 21 : index
    %113 = memref.load %arg1[%c21] : memref<48xf32, #tpu.memory_space<smem>>
    %114 = vector.extract_strided_slice %2 {offsets = [1, 0], sizes = [1, 256], strides = [1, 1]} : vector<4x256xf32> to vector<1x256xf32>
    %115 = vector.broadcast %113 : f32 to vector<1x256xf32>
    %116 = arith.mulf %115, %114 : vector<1x256xf32>
    %117 = arith.addf %112, %116 : vector<1x256xf32>
    %c22 = arith.constant 22 : index
    %118 = memref.load %arg1[%c22] : memref<48xf32, #tpu.memory_space<smem>>
    %119 = vector.extract_strided_slice %2 {offsets = [2, 0], sizes = [1, 256], strides = [1, 1]} : vector<4x256xf32> to vector<1x256xf32>
    %120 = vector.broadcast %118 : f32 to vector<1x256xf32>
    %121 = arith.mulf %120, %119 : vector<1x256xf32>
    %122 = arith.addf %117, %121 : vector<1x256xf32>
    %c23 = arith.constant 23 : index
    %123 = memref.load %arg1[%c23] : memref<48xf32, #tpu.memory_space<smem>>
    %124 = vector.extract_strided_slice %2 {offsets = [3, 0], sizes = [1, 256], strides = [1, 1]} : vector<4x256xf32> to vector<1x256xf32>
    %125 = vector.broadcast %123 : f32 to vector<1x256xf32>
    %126 = arith.mulf %125, %124 : vector<1x256xf32>
    %127 = arith.addf %122, %126 : vector<1x256xf32>
    %c1_10 = arith.constant 1 : index
    %c0_11 = arith.constant 0 : index
    %128 = vector.load %arg6[%c1_10, %c0_11] : memref<4x256xf32, #tpu.memory_space<vmem>>, vector<1x256xf32>
    tpu.vector_store %arg6[%c1_10, %c0_11], %127 {strides = array<i32>} : memref<4x256xf32, #tpu.memory_space<vmem>>, vector<1x256xf32>,
    %c2_12 = arith.constant 2 : index
    %129 = memref.load %arg2[%c2_12] : memref<4xf32, #tpu.memory_space<smem>>
    %c24 = arith.constant 24 : index
    %130 = memref.load %arg1[%c24] : memref<48xf32, #tpu.memory_space<smem>>
    %131 = vector.extract_strided_slice %0 {offsets = [0, 0], sizes = [1, 256], strides = [1, 1]} : vector<4x256xf32> to vector<1x256xf32>
    %132 = vector.broadcast %130 : f32 to vector<1x256xf32>
    %133 = arith.mulf %132, %131 : vector<1x256xf32>
    %134 = vector.broadcast %129 : f32 to vector<1x256xf32>
    %135 = arith.addf %134, %133 : vector<1x256xf32>
    %c25 = arith.constant 25 : index
    %136 = memref.load %arg1[%c25] : memref<48xf32, #tpu.memory_space<smem>>
    %137 = vector.extract_strided_slice %0 {offsets = [1, 0], sizes = [1, 256], strides = [1, 1]} : vector<4x256xf32> to vector<1x256xf32>
    %138 = vector.broadcast %136 : f32 to vector<1x256xf32>
    %139 = arith.mulf %138, %137 : vector<1x256xf32>
    %140 = arith.addf %135, %139 : vector<1x256xf32>
    %c26 = arith.constant 26 : index
    %141 = memref.load %arg1[%c26] : memref<48xf32, #tpu.memory_space<smem>>
    %142 = vector.extract_strided_slice %0 {offsets = [2, 0], sizes = [1, 256], strides = [1, 1]} : vector<4x256xf32> to vector<1x256xf32>
    %143 = vector.broadcast %141 : f32 to vector<1x256xf32>
    %144 = arith.mulf %143, %142 : vector<1x256xf32>
    %145 = arith.addf %140, %144 : vector<1x256xf32>
    %c27 = arith.constant 27 : index
    %146 = memref.load %arg1[%c27] : memref<48xf32, #tpu.memory_space<smem>>
    %147 = vector.extract_strided_slice %0 {offsets = [3, 0], sizes = [1, 256], strides = [1, 1]} : vector<4x256xf32> to vector<1x256xf32>
    %148 = vector.broadcast %146 : f32 to vector<1x256xf32>
    %149 = arith.mulf %148, %147 : vector<1x256xf32>
    %150 = arith.addf %145, %149 : vector<1x256xf32>
    %c28 = arith.constant 28 : index
    %151 = memref.load %arg1[%c28] : memref<48xf32, #tpu.memory_space<smem>>
    %152 = vector.extract_strided_slice %1 {offsets = [0, 0], sizes = [1, 256], strides = [1, 1]} : vector<4x256xf32> to vector<1x256xf32>
    %153 = vector.broadcast %151 : f32 to vector<1x256xf32>
    %154 = arith.mulf %153, %152 : vector<1x256xf32>
    %155 = arith.addf %150, %154 : vector<1x256xf32>
    %c29 = arith.constant 29 : index
    %156 = memref.load %arg1[%c29] : memref<48xf32, #tpu.memory_space<smem>>
    %157 = vector.extract_strided_slice %1 {offsets = [1, 0], sizes = [1, 256], strides = [1, 1]} : vector<4x256xf32> to vector<1x256xf32>
    %158 = vector.broadcast %156 : f32 to vector<1x256xf32>
    %159 = arith.mulf %158, %157 : vector<1x256xf32>
    %160 = arith.addf %155, %159 : vector<1x256xf32>
    %c30 = arith.constant 30 : index
    %161 = memref.load %arg1[%c30] : memref<48xf32, #tpu.memory_space<smem>>
    %162 = vector.extract_strided_slice %1 {offsets = [2, 0], sizes = [1, 256], strides = [1, 1]} : vector<4x256xf32> to vector<1x256xf32>
    %163 = vector.broadcast %161 : f32 to vector<1x256xf32>
    %164 = arith.mulf %163, %162 : vector<1x256xf32>
    %165 = arith.addf %160, %164 : vector<1x256xf32>
    %c31 = arith.constant 31 : index
    %166 = memref.load %arg1[%c31] : memref<48xf32, #tpu.memory_space<smem>>
    %167 = vector.extract_strided_slice %1 {offsets = [3, 0], sizes = [1, 256], strides = [1, 1]} : vector<4x256xf32> to vector<1x256xf32>
    %168 = vector.broadcast %166 : f32 to vector<1x256xf32>
    %169 = arith.mulf %168, %167 : vector<1x256xf32>
    %170 = arith.addf %165, %169 : vector<1x256xf32>
    %c32 = arith.constant 32 : index
    %171 = memref.load %arg1[%c32] : memref<48xf32, #tpu.memory_space<smem>>
    %172 = vector.extract_strided_slice %2 {offsets = [0, 0], sizes = [1, 256], strides = [1, 1]} : vector<4x256xf32> to vector<1x256xf32>
    %173 = vector.broadcast %171 : f32 to vector<1x256xf32>
    %174 = arith.mulf %173, %172 : vector<1x256xf32>
    %175 = arith.addf %170, %174 : vector<1x256xf32>
    %c33 = arith.constant 33 : index
    %176 = memref.load %arg1[%c33] : memref<48xf32, #tpu.memory_space<smem>>
    %177 = vector.extract_strided_slice %2 {offsets = [1, 0], sizes = [1, 256], strides = [1, 1]} : vector<4x256xf32> to vector<1x256xf32>
    %178 = vector.broadcast %176 : f32 to vector<1x256xf32>
    %179 = arith.mulf %178, %177 : vector<1x256xf32>
    %180 = arith.addf %175, %179 : vector<1x256xf32>
    %c34 = arith.constant 34 : index
    %181 = memref.load %arg1[%c34] : memref<48xf32, #tpu.memory_space<smem>>
    %182 = vector.extract_strided_slice %2 {offsets = [2, 0], sizes = [1, 256], strides = [1, 1]} : vector<4x256xf32> to vector<1x256xf32>
    %183 = vector.broadcast %181 : f32 to vector<1x256xf32>
    %184 = arith.mulf %183, %182 : vector<1x256xf32>
    %185 = arith.addf %180, %184 : vector<1x256xf32>
    %c35 = arith.constant 35 : index
    %186 = memref.load %arg1[%c35] : memref<48xf32, #tpu.memory_space<smem>>
    %187 = vector.extract_strided_slice %2 {offsets = [3, 0], sizes = [1, 256], strides = [1, 1]} : vector<4x256xf32> to vector<1x256xf32>
    %188 = vector.broadcast %186 : f32 to vector<1x256xf32>
    %189 = arith.mulf %188, %187 : vector<1x256xf32>
    %190 = arith.addf %185, %189 : vector<1x256xf32>
    %c2_13 = arith.constant 2 : index
    %c0_14 = arith.constant 0 : index
    %191 = vector.load %arg6[%c2_13, %c0_14] : memref<4x256xf32, #tpu.memory_space<vmem>>, vector<1x256xf32>
    tpu.vector_store %arg6[%c2_13, %c0_14], %190 {strides = array<i32>} : memref<4x256xf32, #tpu.memory_space<vmem>>, vector<1x256xf32>,
    %c3_15 = arith.constant 3 : index
    %192 = memref.load %arg2[%c3_15] : memref<4xf32, #tpu.memory_space<smem>>
    %c36 = arith.constant 36 : index
    %193 = memref.load %arg1[%c36] : memref<48xf32, #tpu.memory_space<smem>>
    %194 = vector.extract_strided_slice %0 {offsets = [0, 0], sizes = [1, 256], strides = [1, 1]} : vector<4x256xf32> to vector<1x256xf32>
    %195 = vector.broadcast %193 : f32 to vector<1x256xf32>
    %196 = arith.mulf %195, %194 : vector<1x256xf32>
    %197 = vector.broadcast %192 : f32 to vector<1x256xf32>
    %198 = arith.addf %197, %196 : vector<1x256xf32>
    %c37 = arith.constant 37 : index
    %199 = memref.load %arg1[%c37] : memref<48xf32, #tpu.memory_space<smem>>
    %200 = vector.extract_strided_slice %0 {offsets = [1, 0], sizes = [1, 256], strides = [1, 1]} : vector<4x256xf32> to vector<1x256xf32>
    %201 = vector.broadcast %199 : f32 to vector<1x256xf32>
    %202 = arith.mulf %201, %200 : vector<1x256xf32>
    %203 = arith.addf %198, %202 : vector<1x256xf32>
    %c38 = arith.constant 38 : index
    %204 = memref.load %arg1[%c38] : memref<48xf32, #tpu.memory_space<smem>>
    %205 = vector.extract_strided_slice %0 {offsets = [2, 0], sizes = [1, 256], strides = [1, 1]} : vector<4x256xf32> to vector<1x256xf32>
    %206 = vector.broadcast %204 : f32 to vector<1x256xf32>
    %207 = arith.mulf %206, %205 : vector<1x256xf32>
    %208 = arith.addf %203, %207 : vector<1x256xf32>
    %c39 = arith.constant 39 : index
    %209 = memref.load %arg1[%c39] : memref<48xf32, #tpu.memory_space<smem>>
    %210 = vector.extract_strided_slice %0 {offsets = [3, 0], sizes = [1, 256], strides = [1, 1]} : vector<4x256xf32> to vector<1x256xf32>
    %211 = vector.broadcast %209 : f32 to vector<1x256xf32>
    %212 = arith.mulf %211, %210 : vector<1x256xf32>
    %213 = arith.addf %208, %212 : vector<1x256xf32>
    %c40 = arith.constant 40 : index
    %214 = memref.load %arg1[%c40] : memref<48xf32, #tpu.memory_space<smem>>
    %215 = vector.extract_strided_slice %1 {offsets = [0, 0], sizes = [1, 256], strides = [1, 1]} : vector<4x256xf32> to vector<1x256xf32>
    %216 = vector.broadcast %214 : f32 to vector<1x256xf32>
    %217 = arith.mulf %216, %215 : vector<1x256xf32>
    %218 = arith.addf %213, %217 : vector<1x256xf32>
    %c41 = arith.constant 41 : index
    %219 = memref.load %arg1[%c41] : memref<48xf32, #tpu.memory_space<smem>>
    %220 = vector.extract_strided_slice %1 {offsets = [1, 0], sizes = [1, 256], strides = [1, 1]} : vector<4x256xf32> to vector<1x256xf32>
    %221 = vector.broadcast %219 : f32 to vector<1x256xf32>
    %222 = arith.mulf %221, %220 : vector<1x256xf32>
    %223 = arith.addf %218, %222 : vector<1x256xf32>
    %c42 = arith.constant 42 : index
    %224 = memref.load %arg1[%c42] : memref<48xf32, #tpu.memory_space<smem>>
    %225 = vector.extract_strided_slice %1 {offsets = [2, 0], sizes = [1, 256], strides = [1, 1]} : vector<4x256xf32> to vector<1x256xf32>
    %226 = vector.broadcast %224 : f32 to vector<1x256xf32>
    %227 = arith.mulf %226, %225 : vector<1x256xf32>
    %228 = arith.addf %223, %227 : vector<1x256xf32>
    %c43 = arith.constant 43 : index
    %229 = memref.load %arg1[%c43] : memref<48xf32, #tpu.memory_space<smem>>
    %230 = vector.extract_strided_slice %1 {offsets = [3, 0], sizes = [1, 256], strides = [1, 1]} : vector<4x256xf32> to vector<1x256xf32>
    %231 = vector.broadcast %229 : f32 to vector<1x256xf32>
    %232 = arith.mulf %231, %230 : vector<1x256xf32>
    %233 = arith.addf %228, %232 : vector<1x256xf32>
    %c44 = arith.constant 44 : index
    %234 = memref.load %arg1[%c44] : memref<48xf32, #tpu.memory_space<smem>>
    %235 = vector.extract_strided_slice %2 {offsets = [0, 0], sizes = [1, 256], strides = [1, 1]} : vector<4x256xf32> to vector<1x256xf32>
    %236 = vector.broadcast %234 : f32 to vector<1x256xf32>
    %237 = arith.mulf %236, %235 : vector<1x256xf32>
    %238 = arith.addf %233, %237 : vector<1x256xf32>
    %c45 = arith.constant 45 : index
    %239 = memref.load %arg1[%c45] : memref<48xf32, #tpu.memory_space<smem>>
    %240 = vector.extract_strided_slice %2 {offsets = [1, 0], sizes = [1, 256], strides = [1, 1]} : vector<4x256xf32> to vector<1x256xf32>
    %241 = vector.broadcast %239 : f32 to vector<1x256xf32>
    %242 = arith.mulf %241, %240 : vector<1x256xf32>
    %243 = arith.addf %238, %242 : vector<1x256xf32>
    %c46 = arith.constant 46 : index
    %244 = memref.load %arg1[%c46] : memref<48xf32, #tpu.memory_space<smem>>
    %245 = vector.extract_strided_slice %2 {offsets = [2, 0], sizes = [1, 256], strides = [1, 1]} : vector<4x256xf32> to vector<1x256xf32>
    %246 = vector.broadcast %244 : f32 to vector<1x256xf32>
    %247 = arith.mulf %246, %245 : vector<1x256xf32>
    %248 = arith.addf %243, %247 : vector<1x256xf32>
    %c47 = arith.constant 47 : index
    %249 = memref.load %arg1[%c47] : memref<48xf32, #tpu.memory_space<smem>>
    %250 = vector.extract_strided_slice %2 {offsets = [3, 0], sizes = [1, 256], strides = [1, 1]} : vector<4x256xf32> to vector<1x256xf32>
    %251 = vector.broadcast %249 : f32 to vector<1x256xf32>
    %252 = arith.mulf %251, %250 : vector<1x256xf32>
    %253 = arith.addf %248, %252 : vector<1x256xf32>
    %c3_16 = arith.constant 3 : index
    %c0_17 = arith.constant 0 : index
    %254 = vector.load %arg6[%c3_16, %c0_17] : memref<4x256xf32, #tpu.memory_space<vmem>>, vector<1x256xf32>
    tpu.vector_store %arg6[%c3_16, %c0_17], %253 {strides = array<i32>} : memref<4x256xf32, #tpu.memory_space<vmem>>, vector<1x256xf32>,
    return
  }
  func.func @transform_0(%arg0: i32) -> i32 {
    %c0_i32 = arith.constant 0 : i32
    %c0_i32_0 = arith.constant 0 : i32
    return %c0_i32 : i32
  }
  func.func @transform_1(%arg0: i32) -> i32 {
    %c0_i32 = arith.constant 0 : i32
    %c0_i32_0 = arith.constant 0 : i32
    return %c0_i32 : i32
  }
  func.func @transform_2(%arg0: i32) -> (i32, i32) {
    %c0_i32 = arith.constant 0 : i32
    %c0_i32_0 = arith.constant 0 : i32
    %c0_i32_1 = arith.constant 0 : i32
    return %c0_i32, %c0_i32_0 : i32, i32
  }
  func.func @transform_3(%arg0: i32) -> (i32, i32) {
    %c0_i32 = arith.constant 0 : i32
    %c0_i32_0 = arith.constant 0 : i32
    %c0_i32_1 = arith.constant 0 : i32
    return %c0_i32, %c0_i32_0 : i32, i32
  }
  func.func @transform_4(%arg0: i32) -> (i32, i32) {
    %c0_i32 = arith.constant 0 : i32
    %c0_i32_0 = arith.constant 0 : i32
    %c0_i32_1 = arith.constant 0 : i32
    return %c0_i32, %c0_i32_0 : i32, i32
  }
  func.func @transform_5(%arg0: i32) -> (i32, i32) {
    %c0_i32 = arith.constant 0 : i32
    %c0_i32_0 = arith.constant 0 : i32
    %c0_i32_1 = arith.constant 0 : i32
    return %c0_i32, %c0_i32_0 : i32, i32
  }
}

</mosaic_0001>

<bundles_post_ra>
// kernel: squeeze.12
= control target key start
LH: loop header
LB: loop body
LE: loop exit
PB: predicated region body
PF: predicated region fallthrough
CT: control target
= control target key end

     0   :  { %s15_s6 = smov 3  ;;  %s18_s7 = smov 12  ;;  %vm20_vm0 = vcmask 1043458   ;;  %vm25_vm1 = vcmask 1045508   ;;  %vm30_vm2 = vcmask 1047558   ;;  %vm4_vm3 = vcmask 1047556   ;;  %s364_s0 = inlined_call_operand.vmem [shape: f32[1,4,16,16], index: 0, kind: input, shape index: {}]   ;;  %s365_s1 = inlined_call_operand.vmem [shape: f32[4,256], index: 1, kind: output, shape index: {}]  }
   0x1   :  { %v193_v0 = vld [vmem:[%s364_s0 + $0x7] ss:$16 sm:%s15_s6]   ;;  %s23_s12 = smov 48  ;;  %s28_s13 = smov 192  ;;  %vm6_vm4 = vcmask 130048   ;;  %vm34_vm5 = vcmask 1048448  }
   0x2   :  { %v194_v1 = vld [vmem:[%s364_s0 + $0x7] ss:$16 sm:%s18_s7]   ;;  %v195_v3 = vld [vmem:[%s364_s0 - $0x31] ss:$16 sm:%s23_s12]   ;;  %s63_s18 = smov 3  ;;  %s66_s21 = smov 12 }
   0x3   :  { %v21_v2 = vsel %vm20_vm0, %v194_v1, %v193_v0  ;;  %v196_v4 = vld [vmem:[%s364_s0 - $0x31] ss:$16 sm:%s28_s13]   ;;  %v201_v6 = vld [vmem:[%s364_s0 + $0x5] ss:$16 sm:%s63_s18]   ;;  %s71_s22 = smov 48  ;;  %s76_s27 = smov 192 }
   0x4   :  { %v26_v5 = vsel %vm25_vm1, %v195_v3, %v21_v2  ;;  %v202_v8 = vld [vmem:[%s364_s0 + $0x5] ss:$16 sm:%s66_s21]   ;;  %v203_v9 = vld [vmem:[%s364_s0 - $0x33] ss:$16 sm:%s71_s22]   ;;  %s229_s28 = smov 112   ;;  %s39_s2 = smov 3 }
   0x5   :  { %v31_v7 = vsel %vm30_vm2, %v196_v4, %v26_v5  ;;  %v69_v10 = vsel %vm20_vm0, %v202_v8, %v201_v6  ;;  %v204_v11 = vld [vmem:[%s364_s0 - $0x33] ss:$16 sm:%s76_s27]   ;;  %s42_s3 = smov 12  ;;  %v197_v13 = vld [vmem:[%s364_s0 + $0x6] ss:$16 sm:%s39_s2]   ;;  %s47_s8 = smov 48 }
   0x6   :  { %32 = vrot.lane.b32.xlu0 %v31_v7, %s229_s28  ;;  %v74_v12 = vsel %vm25_vm1, %v203_v9, %v69_v10  ;;  %v198_v14 = vld [vmem:[%s364_s0 + $0x6] ss:$16 sm:%s42_s3]   ;;  %s52_s9 = smov 192  ;;  %s87_s14 = smov 3  ;;  %vm58_vm6 = vcmask 917248   ;;  %vm82_vm7 = vcmask 786048  }
   0x7   :  { %v79_v15 = vsel %vm30_vm2, %v204_v11, %v74_v12  ;;  %v45_v16 = vsel %vm20_vm0, %v198_v14, %v197_v13  ;;  %v199_v17 = vld [vmem:[%s364_s0 - $0x32] ss:$16 sm:%s47_s8]   ;;  %s230_s15 = smov 80   ;;  %v205_v20 = vld [vmem:[%s364_s0 + $0x4] ss:$16 sm:%s87_s14]   ;;  %s90_s18 = smov 12 }
   0x8   :  { %v200_v18 = vld [vmem:[%s364_s0 - $0x32] ss:$16 sm:%s52_s9]   ;;  %80 = vrot.lane.b32.xlu1 %v79_v15, %s230_s15  ;;  %v50_v19 = vsel %vm25_vm1, %v199_v17, %v45_v16  ;;  %s95_s19 = smov 48  ;;  %s100_s24 = smov 192  ;;  %vm106_vm8 = vcmask 654848   ;;  %vm130_vm9 = vcmask 523648  }
   0x9   :  { %v55_v21 = vsel %vm30_vm2, %v200_v18, %v50_v19  ;;  %v206_v22 = vld [vmem:[%s364_s0 + $0x4] ss:$16 sm:%s90_s18]   ;;  %v207_v23 = vld [vmem:[%s364_s0 - $0x34] ss:$16 sm:%s95_s19]   ;;  %s231_s25 = smov 96   ;;  %s111_s28 = smov 3 }
   0xa   :  { %56 = vrot.lane.b32.xlu0 %v55_v21, %s231_s25  ;;  %v93_v24 = vsel %vm20_vm0, %v206_v22, %v205_v20  ;;  %v208_v25 = vld [vmem:[%s364_s0 - $0x34] ss:$16 sm:%s100_s24]   ;;  %s114_s29 = smov 12  ;;  %s119_s5 = smov 48  ;;  %vm154_vm10 = vcmask 392448   ;;  %vm178_vm11 = vcmask 261248  }
   0xb   :  { %v98_v26 = vsel %vm25_vm1, %v207_v23, %v93_v24  ;;  %v209_v27 = vld [vmem:[%s364_s0 + $0x3] ss:$16 sm:%s111_s28]   ;;  %s124_s6 = smov 192  ;;  %v211_v31 = vld [vmem:[%s364_s0 - $0x35] ss:$16 sm:%s119_s5]   ;;  %s135_s11 = smov 3 }
   0xc   :  { %v210_v28 = vld [vmem:[%s364_s0 + $0x3] ss:$16 sm:%s114_s29]   ;;  %v103_v29 = vsel %vm30_vm2, %v208_v25, %v98_v26  ;;  %v212_v32 = vld [vmem:[%s364_s0 - $0x35] ss:$16 sm:%s124_s6]   ;;  %s232_s12 = smov 64   ;;  %s138_s15 = smov 12 }
   0xd   :  { %v117_v30 = vsel %vm20_vm0, %v210_v28, %v209_v27  ;;  %104 = vrot.lane.b32.xlu1 %v103_v29, %s232_s12  ;;  %v213_v34 = vld [vmem:[%s364_s0 + $0x2] ss:$16 sm:%s135_s11]   ;;  %s143_s16 = smov 48  ;;  %s148_s21 = smov 192 }
   0xe   :  { %v122_v33 = vsel %vm25_vm1, %v211_v31, %v117_v30  ;;  %v214_v36 = vld [vmem:[%s364_s0 + $0x2] ss:$16 sm:%s138_s15]   ;;  %v215_v37 = vld [vmem:[%s364_s0 - $0x36] ss:$16 sm:%s143_s16]   ;;  %s233_s22 = smov 48   ;;  %s159_s25 = smov 3 }
   0xf   :  { %v127_v35 = vsel %vm30_vm2, %v212_v32, %v122_v33  ;;  %v141_v38 = vsel %vm20_vm0, %v214_v36, %v213_v34  ;;  %v216_v39 = vld [vmem:[%s364_s0 - $0x36] ss:$16 sm:%s148_s21]   ;;  %s162_s26 = smov 12  ;;  %v217_v41 = vld [vmem:[%s364_s0 + $0x1] ss:$16 sm:%s159_s25]   ;;  %s167_s2 = smov 48 }
  0x10   :  { %128 = vrot.lane.b32.xlu0 %v127_v35, %s233_s22  ;;  %v146_v40 = vsel %vm25_vm1, %v215_v37, %v141_v38  ;;  %v218_v42 = vld [vmem:[%s364_s0 + $0x1] ss:$16 sm:%s162_s26]   ;;  %s172_s3 = smov 192  ;;  %s234_s8 = smov 32  }
  0x11   :  { %v151_v43 = vsel %vm30_vm2, %v216_v39, %v146_v40  ;;  %v165_v44 = vsel %vm20_vm0, %v218_v42, %v217_v41  ;;  %v219_v45 = vld [vmem:[%s364_s0 - $0x37] ss:$16 sm:%s167_s2]   ;;  %v2_v48 = vld [vmem:[%s364_s0] ss:$8 sm:$0xf]  }
  0x12   :  { %v220_v46 = vld [vmem:[%s364_s0 - $0x37] ss:$16 sm:%s172_s3]   ;;  %152 = vrot.lane.b32.xlu1 %v151_v43, %s234_s8  ;;  %v170_v47 = vsel %vm25_vm1, %v219_v45, %v165_v44  ;;  %v3_v49 = vld [vmem:[%s364_s0] ss:$8 sm:$0xf0]   ;;  %s235_s0 = smov 16  }
  0x13   :  { %v175_v50 = vsel %vm30_vm2, %v220_v46, %v170_v47  ;;  %v5_v51 = vsel %vm4_vm3, %v3_v49, %v2_v48 }
  0x14   :  { %176 = vrot.lane.b32.xlu0 %v175_v50, %s235_s0  ;;  %7 = vst.msk [vmem:[#allocation0] ss:$8 sm:$0x3] %vm6_vm4, %v5_v51   ;;  %9 = vst.msk [vmem:[#allocation0 - $0xf] ss:$8 sm:$0xc] %vm6_vm4, %v5_v51  }
  0x15   :  { %11 = vst.msk [vmem:[#allocation0 - $0x1e] ss:$8 sm:$0x30] %vm6_vm4, %v5_v51   ;;  %13 = vst.msk [vmem:[#allocation0 - $0x2d] ss:$8 sm:$0xc0] %vm6_vm4, %v5_v51  }
  0x78   :  { %v33_v52 = vpop.permute.xlu0 %32  }
  0x79   :  { %35 = vst.msk [vmem:[#allocation0] sm:$0xf] %vm34_vm5, %v33_v52   ;;  %37 = vst.msk [vmem:[#allocation0 + $0x4] sm:$0xf0] %vm34_vm5, %v33_v52  }
  0x7a   :  { %v81_v53 = vpop.permute.xlu1 %80  }
  0x7c   :  { %v57_v54 = vpop.permute.xlu0 %56  }
  0x7d   :  { %59 = vst.msk [vmem:[#allocation0] sm:$0xf] %vm58_vm6, %v57_v54   ;;  %61 = vst.msk [vmem:[#allocation0 + $0x4] sm:$0xf0] %vm58_vm6, %v57_v54  }
  0x7e   :  { %83 = vst.msk [vmem:[#allocation0] sm:$0xf] %vm82_vm7, %v81_v53   ;;  %85 = vst.msk [vmem:[#allocation0 + $0x4] sm:$0xf0] %vm82_vm7, %v81_v53  }
  0x7f   :  { %v105_v55 = vpop.permute.xlu1 %104  }
  0x80   :  { %107 = vst.msk [vmem:[#allocation0] sm:$0xf] %vm106_vm8, %v105_v55   ;;  %109 = vst.msk [vmem:[#allocation0 + $0x4] sm:$0xf0] %vm106_vm8, %v105_v55  }
  0x82   :  { %v129_v56 = vpop.permute.xlu0 %128  }
  0x83   :  { %131 = vst.msk [vmem:[#allocation0] sm:$0xf] %vm130_vm9, %v129_v56   ;;  %133 = vst.msk [vmem:[#allocation0 + $0x4] sm:$0xf0] %vm130_vm9, %v129_v56  }
  0x84   :  { %v153_v57 = vpop.permute.xlu1 %152  }
  0x85   :  { %155 = vst.msk [vmem:[#allocation0] sm:$0xf] %vm154_vm10, %v153_v57   ;;  %157 = vst.msk [vmem:[#allocation0 + $0x4] sm:$0xf0] %vm154_vm10, %v153_v57  }
  0x86   :  { %v177_v58 = vpop.permute.xlu0 %176  }
  0x87   :  { %179 = vst.msk [vmem:[#allocation0] sm:$0xf] %vm178_vm11, %v177_v58   ;;  %181 = vst.msk [vmem:[#allocation0 + $0x4] sm:$0xf0] %vm178_vm11, %v177_v58  }
  0x8e   :  { %v185_v59 = vld [vmem:[#allocation0] sm:$0xf]  ;;  %v189_v60 = vld [vmem:[#allocation0 + $0x8] sm:$0xf] }
  0x8f   :  { %187 = vst [vmem:[%s365_s1] sm:$0xf] %v185_v59  ;;  %221 = vst [vmem:[%s365_s1 + $0x4] sm:$0xf] %v189_v60 }

// kernel: squeeze.11
= control target key start
LH: loop header
LB: loop body
LE: loop exit
PB: predicated region body
PF: predicated region fallthrough
CT: control target
= control target key end

     0   :  { %2 = vsyncpa [#allocation1], 0  ;;  %s237_s6 = smov [#allocation0]   ;;  %s295_s0 = inlined_call_operand.hbm [shape: f32[1,4,16,16], index: 0, kind: input, shape index: {}]   ;;  %s296_s1 = inlined_call_operand.vmem [shape: f32[4,256], index: 1, kind: output, shape index: {}]  }
   0x1   :  { %s7_s7 = sshll.u32 %s237_s6, 4  ;;  %s213_s10 = scalar_lea.hbm %s295_s0, 1024  ;;  %s8_s7 = int_to_ptr.vmem [resolvable:$true] %s7_s7 }
   0x2   :  { %p214_p0 = scmp.ne.s32.totalorder %s295_s0, %s213_s10  ;;  %p217_p1 = scmp.lt.u32.totalorder %s213_s10, %s295_s0 }
   0x4   :  { %p219_p2 = pnand %p217_p1, %p214_p0 }
   0x6   :  { %222 = shalt.err (!%p219_p2)
}
   0x7   :  { %s223_s15 = scalar_lea.vmem %s8_s7, 1024  ;;  %p228_p4 = scmp.lt.s32.totalorder %s8_s7, %s8_s7 }
   0x8   :  { %p224_p3 = scmp.ne.s32.totalorder %s8_s7, %s223_s15  ;;  %p229_p5 = scmp.lt.s32.totalorder %s223_s15, %s223_s15 }
   0xa   :  { %p230_p6 = por %p229_p5, %p228_p4 }
   0xc   :  { %p231_p7 = pnand %p230_p6, %p224_p3 }
   0xe   :  { %234 = shalt.err (!%p231_p7)
}
   0xf   :  { %10 = dma.hbm_to_vmem [thread:$0]  %s295_s0, 1024, %s8_s7, [#allocation1]  }
  0x10   :  { %235 = dma.done.wait [#allocation1], 1024  }
  0x11   :  { %236 = vsyncadd [#allocation1], 4294966272  ;;  %s25_s0 = smov 3  ;;  %s28_s18 = smov 12  ;;  %vm30_vm0 = vcmask 1043458   ;;  %vm35_vm1 = vcmask 1045508  }
  0x12   :  { %s33_s19 = smov 48  ;;  %s38_s20 = smov 192  ;;  %vm40_vm2 = vcmask 1047558   ;;  %v26_v0 = vld [vmem:[#allocation0 + $0x7] ss:$16 sm:%s25_s0]   ;;  %vm14_vm3 = vcmask 1047556  }
  0x13   :  { %s73_s21 = smov 3  ;;  %s76_s22 = smov 12  ;;  %v29_v1 = vld [vmem:[#allocation0 + $0x7] ss:$16 sm:%s28_s18]   ;;  %v34_v2 = vld [vmem:[#allocation0 - $0x31] ss:$16 sm:%s33_s19]  }
  0x14   :  { %s81_s23 = smov 48  ;;  %s86_s24 = smov 192  ;;  %v31_v3 = vsel %vm30_vm0, %v29_v1, %v26_v0  ;;  %v39_v4 = vld [vmem:[#allocation0 - $0x31] ss:$16 sm:%s38_s20]   ;;  %v74_v5 = vld [vmem:[#allocation0 + $0x5] ss:$16 sm:%s73_s21]  }
  0x15   :  { %s49_s25 = smov 3  ;;  %s52_s26 = smov 12  ;;  %v77_v6 = vld [vmem:[#allocation0 + $0x5] ss:$16 sm:%s76_s22]   ;;  %v36_v7 = vsel %vm35_vm1, %v34_v2, %v31_v3  ;;  %v82_v9 = vld [vmem:[#allocation0 - $0x33] ss:$16 sm:%s81_s23]  }
  0x16   :  { %s57_s27 = smov 48  ;;  %s62_s28 = smov 192  ;;  %v79_v8 = vsel %vm30_vm0, %v77_v6, %v74_v5  ;;  %v87_v10 = vld [vmem:[#allocation0 - $0x33] ss:$16 sm:%s86_s24]   ;;  %v50_v11 = vld [vmem:[#allocation0 + $0x6] ss:$16 sm:%s49_s25]   ;;  %v41_v12 = vsel %vm40_vm2, %v39_v4, %v36_v7 }
  0x17   :  { %v84_v13 = vsel %vm35_vm1, %v82_v9, %v79_v8  ;;  %v53_v14 = vld [vmem:[#allocation0 + $0x6] ss:$16 sm:%s52_s26]   ;;  %v58_v15 = vld [vmem:[#allocation0 - $0x32] ss:$16 sm:%s57_s27]   ;;  %s238_s29 = smov 112   ;;  %s97_s30 = smov 3 }
  0x18   :  { %v63_v16 = vld [vmem:[#allocation0 - $0x32] ss:$16 sm:%s62_s28]   ;;  %42 = vrot.lane.b32.xlu0 %v41_v12, %s238_s29  ;;  %v89_v17 = vsel %vm40_vm2, %v87_v10, %v84_v13  ;;  %v55_v18 = vsel %vm30_vm0, %v53_v14, %v50_v11  ;;  %s239_s2 = smov 80   ;;  %v98_v20 = vld [vmem:[#allocation0 + $0x4] ss:$16 sm:%s97_s30]   ;;  %s100_s3 = smov 12 }
  0x19   :  { %90 = vrot.lane.b32.xlu1 %v89_v17, %s239_s2  ;;  %v60_v19 = vsel %vm35_vm1, %v58_v15, %v55_v18  ;;  %s105_s4 = smov 48  ;;  %v101_v22 = vld [vmem:[#allocation0 + $0x4] ss:$16 sm:%s100_s3]   ;;  %s110_s5 = smov 192  ;;  %vm16_vm4 = vcmask 130048   ;;  %vm44_vm5 = vcmask 1048448  }
  0x1a   :  { %v65_v21 = vsel %vm40_vm2, %v63_v16, %v60_v19  ;;  %v106_v23 = vld [vmem:[#allocation0 - $0x34] ss:$16 sm:%s105_s4]   ;;  %v103_v24 = vsel %vm30_vm0, %v101_v22, %v98_v20  ;;  %s121_s6 = smov 3  ;;  %s124_s7 = smov 12  ;;  %vm68_vm6 = vcmask 917248   ;;  %vm92_vm7 = vcmask 786048  }
  0x1b   :  { %v111_v25 = vld [vmem:[#allocation0 - $0x34] ss:$16 sm:%s110_s5]   ;;  %s240_s8 = smov 96   ;;  %v108_v26 = vsel %vm35_vm1, %v106_v23, %v103_v24  ;;  %v122_v27 = vld [vmem:[#allocation0 + $0x3] ss:$16 sm:%s121_s6]   ;;  %s129_s9 = smov 48 }
  0x1c   :  { %66 = vrot.lane.b32.xlu0 %v65_v21, %s240_s8  ;;  %v125_v28 = vld [vmem:[#allocation0 + $0x3] ss:$16 sm:%s124_s7]   ;;  %s134_s10 = smov 192  ;;  %v113_v29 = vsel %vm40_vm2, %v111_v25, %v108_v26  ;;  %v130_v31 = vld [vmem:[#allocation0 - $0x35] ss:$16 sm:%s129_s9]   ;;  %s145_s11 = smov 3 }
  0x1d   :  { %v127_v30 = vsel %vm30_vm0, %v125_v28, %v122_v27  ;;  %v135_v32 = vld [vmem:[#allocation0 - $0x35] ss:$16 sm:%s134_s10]   ;;  %s241_s12 = smov 64   ;;  %v146_v34 = vld [vmem:[#allocation0 + $0x2] ss:$16 sm:%s145_s11]   ;;  %s148_s13 = smov 12 }
  0x1e   :  { %114 = vrot.lane.b32.xlu1 %v113_v29, %s241_s12  ;;  %v132_v33 = vsel %vm35_vm1, %v130_v31, %v127_v30  ;;  %s153_s14 = smov 48  ;;  %v149_v36 = vld [vmem:[#allocation0 + $0x2] ss:$16 sm:%s148_s13]   ;;  %s158_s15 = smov 192  ;;  %vm116_vm8 = vcmask 654848   ;;  %vm140_vm9 = vcmask 523648  }
  0x1f   :  { %v137_v35 = vsel %vm40_vm2, %v135_v32, %v132_v33  ;;  %v154_v37 = vld [vmem:[#allocation0 - $0x36] ss:$16 sm:%s153_s14]   ;;  %v12_v38 = vld [vmem:[#allocation0] ss:$8 sm:$0xf]   ;;  %s242_s16 = smov 48   ;;  %v151_v39 = vsel %vm30_vm0, %v149_v36, %v146_v34 }
  0x20   :  { %138 = vrot.lane.b32.xlu0 %v137_v35, %s242_s16  ;;  %v159_v40 = vld [vmem:[#allocation0 - $0x36] ss:$16 sm:%s158_s15]   ;;  %s169_s17 = smov 3  ;;  %s172_s0 = smov 12  ;;  %v156_v41 = vsel %vm35_vm1, %v154_v37, %v151_v39  ;;  %vm164_vm10 = vcmask 392448   ;;  %vm188_vm11 = vcmask 261248  }
  0x21   :  { %v170_v42 = vld [vmem:[#allocation0 + $0x1] ss:$16 sm:%s169_s17]   ;;  %s177_s18 = smov 48  ;;  %s182_s19 = smov 192  ;;  %v161_v44 = vsel %vm40_vm2, %v159_v40, %v156_v41 }
  0x22   :  { %v173_v43 = vld [vmem:[#allocation0 + $0x1] ss:$16 sm:%s172_s0]   ;;  %v178_v46 = vld [vmem:[#allocation0 - $0x37] ss:$16 sm:%s177_s18]   ;;  %s243_s20 = smov 32   ;;  %s244_s21 = smov 16  }
  0x23   :  { %v175_v45 = vsel %vm30_vm0, %v173_v43, %v170_v42  ;;  %v183_v47 = vld [vmem:[#allocation0 - $0x37] ss:$16 sm:%s182_s19]   ;;  %162 = vrot.lane.b32.xlu1 %v161_v44, %s243_s20  ;;  %v13_v49 = vld [vmem:[#allocation0] ss:$8 sm:$0xf0]  }
  0x24   :  { %v180_v48 = vsel %vm35_vm1, %v178_v46, %v175_v45  ;;  %v15_v51 = vsel %vm14_vm3, %v13_v49, %v12_v38 }
  0x25   :  { %v185_v50 = vsel %vm40_vm2, %v183_v47, %v180_v48  ;;  %17 = vst.msk [vmem:[#allocation2] ss:$8 sm:$0x3] %vm16_vm4, %v15_v51   ;;  %19 = vst.msk [vmem:[#allocation2 - $0xf] ss:$8 sm:$0xc] %vm16_vm4, %v15_v51  }
  0x26   :  { %186 = vrot.lane.b32.xlu0 %v185_v50, %s244_s21  ;;  %21 = vst.msk [vmem:[#allocation2 - $0x1e] ss:$8 sm:$0x30] %vm16_vm4, %v15_v51   ;;  %23 = vst.msk [vmem:[#allocation2 - $0x2d] ss:$8 sm:$0xc0] %vm16_vm4, %v15_v51  }
  0x8a   :  { %v43_v52 = vpop.permute.xlu0 %42  }
  0x8b   :  { %v91_v53 = vpop.permute.xlu1 %90   ;;  %45 = vst.msk [vmem:[#allocation2] sm:$0xf] %vm44_vm5, %v43_v52   ;;  %47 = vst.msk [vmem:[#allocation2 + $0x4] sm:$0xf0] %vm44_vm5, %v43_v52  }
  0x8e   :  { %v67_v54 = vpop.permute.xlu0 %66  }
  0x8f   :  { %69 = vst.msk [vmem:[#allocation2] sm:$0xf] %vm68_vm6, %v67_v54   ;;  %71 = vst.msk [vmem:[#allocation2 + $0x4] sm:$0xf0] %vm68_vm6, %v67_v54  }
  0x90   :  { %93 = vst.msk [vmem:[#allocation2] sm:$0xf] %vm92_vm7, %v91_v53   ;;  %95 = vst.msk [vmem:[#allocation2 + $0x4] sm:$0xf0] %vm92_vm7, %v91_v53   ;;  %v115_v55 = vpop.permute.xlu1 %114  }
  0x91   :  { %117 = vst.msk [vmem:[#allocation2] sm:$0xf] %vm116_vm8, %v115_v55   ;;  %119 = vst.msk [vmem:[#allocation2 + $0x4] sm:$0xf0] %vm116_vm8, %v115_v55  }
  0x92   :  { %v139_v56 = vpop.permute.xlu0 %138  }
  0x93   :  { %141 = vst.msk [vmem:[#allocation2] sm:$0xf] %vm140_vm9, %v139_v56   ;;  %143 = vst.msk [vmem:[#allocation2 + $0x4] sm:$0xf0] %vm140_vm9, %v139_v56  }
  0x95   :  { %v163_v57 = vpop.permute.xlu1 %162  }
  0x96   :  { %165 = vst.msk [vmem:[#allocation2] sm:$0xf] %vm164_vm10, %v163_v57   ;;  %167 = vst.msk [vmem:[#allocation2 + $0x4] sm:$0xf0] %vm164_vm10, %v163_v57  }
  0x98   :  { %v187_v58 = vpop.permute.xlu0 %186  }
  0x99   :  { %189 = vst.msk [vmem:[#allocation2] sm:$0xf] %vm188_vm11, %v187_v58   ;;  %191 = vst.msk [vmem:[#allocation2 + $0x4] sm:$0xf0] %vm188_vm11, %v187_v58  }
  0xa0   :  { %v195_v59 = vld [vmem:[#allocation2] sm:$0xf]  ;;  %v199_v60 = vld [vmem:[#allocation2 + $0x8] sm:$0xf] }
  0xa1   :  { %197 = vst [vmem:[%s296_s1] sm:$0xf] %v195_v59  ;;  %204 = vst [vmem:[%s296_s1 + $0x4] sm:$0xf] %v199_v60 }
  0xa2   :  { %203 = vsyncpa [#allocation1], 1 }

// kernel: cfg_denoiser.1
= control target key start
LH: loop header
LB: loop body
LE: loop exit
PB: predicated region body
PF: predicated region fallthrough
CT: control target
= control target key end

     0   :  { %10 = vsyncpa [#allocation3], 0  ;;  %s881_s0 = inlined_call_operand.vmem [shape: f32[48], index: 0, kind: input, shape index: {}]   ;;  %s882_s1 = inlined_call_operand.vmem [shape: f32[4], index: 1, kind: input, shape index: {}]   ;;  %s883_s2 = inlined_call_operand.vmem [shape: f32[4,256], index: 2, kind: input, shape index: {}]   ;;  %s884_s3 = inlined_call_operand.vmem [shape: f32[4,256], index: 3, kind: input, shape index: {}]   ;;  %s885_s4 = inlined_call_operand.vmem [shape: f32[4,256], index: 4, kind: input, shape index: {}]   ;;  %s886_s5 = inlined_call_operand.vmem [shape: f32[4,256], index: 5, kind: output, shape index: {}]  }
   0x1   :  { %s18_s20 = sshll.u32 %s881_s0, 4  ;;  %s19_s20 = int_to_ptr.vmem [resolvable:$true] %s18_s20 }
   0x2   :  { %11 = vsyncpa [#allocation5], 0  ;;  %s28_s23 = sshll.u32 %s882_s1, 4  ;;  %s565_s24 = scalar_lea.vmem %s19_s20, 16  ;;  %s29_s23 = int_to_ptr.vmem [resolvable:$true] %s28_s23 }
   0x3   :  { %p566_p0 = scmp.ne.s32.totalorder %s19_s20, %s565_s24  ;;  %p570_p1 = scmp.lt.s32.totalorder %s19_s20, %s19_s20 }
   0x4   :  { %p571_p2 = scmp.lt.s32.totalorder %s565_s24, %s565_s24 }
   0x6   :  { %p572_p3 = por %p571_p2, %p570_p1 }
   0x8   :  { %p573_p4 = pnand %p572_p3, %p566_p0 }
   0xa   :  { %576 = shalt.err (!%p573_p4)
}
   0xb   :  { %s593_s25 = smov [#allocation2]   ;;  %s577_s26 = scalar_lea.vmem %s29_s23, 16 }
   0xc   :  { %21 = dma.vmem_to_smem %s19_s20, 16, %s593_s25, [#allocation3]  }
   0xd   :  { %p578_p5 = scmp.ne.s32.totalorder %s29_s23, %s577_s26  ;;  %p582_p6 = scmp.lt.s32.totalorder %s29_s23, %s29_s23 }
   0xe   :  { %p583_p7 = scmp.lt.s32.totalorder %s577_s26, %s577_s26 }
  0x10   :  { %p584_p8 = por %p583_p7, %p582_p6 }
  0x12   :  { %p585_p9 = pnand %p584_p8, %p578_p5 }
  0x14   :  { %588 = shalt.err (!%p585_p9)
}
  0x15   :  { %s594_s0 = smov [#allocation4]  }
  0x16   :  { %31 = dma.vmem_to_smem %s29_s23, 16, %s594_s0, [#allocation5]  }
  0x17   :  { %589 = dma.done.wait [#allocation3], 16  }
  0x18   :  { %590 = vsyncadd [#allocation3], 4294967280 }
  0x19   :  { %591 = dma.done.wait [#allocation5], 16  }
  0x1a   :  { %592 = vsyncadd [#allocation5], 4294967280 }
  0x1b   :  { %44 = sfence }
  0x1c   :  { %s632_s1 = sld [smem:[#allocation4]]  ;;  %s473_s28 = sld [smem:[#allocation2 + $0x1]]  ;;  %v138_v0 = vlaneseq  ;;  %v595_v1 = vmov 1966171168   ;;  %v643_v3 = vld [vmem:[%s883_s2] sm:$0xff] }
  0x1d   :  { %s49_s27 = sld [smem:[#allocation2]]  ;;  %s475_s29 = sld [smem:[#allocation2 + $0x2]]  ;;  %v136_v2 = vunpack.c.l.s4 %v595_v1  ;;  %v657_v5 = vld [vmem:[%s884_s3] sm:$0xff] }
  0x1e   :  { %s477_s30 = sld [smem:[#allocation2 + $0x3]]  ;;  %s634_s6 = sld [smem:[#allocation2 + $0x4]]  ;;  %v139_v4 = vshrl.u32 %v138_v0, 7  ;;  %v685_v25 = vld [vmem:[%s885_s4] sm:$0xff]  ;;  %vm766_vm0 = vcmp.lt.s32.totalorder %v138_v0, 256 }
  0x1f   :  { %s480_s7 = sld [smem:[#allocation2 + $0x5]]  ;;  %s636_s8 = sld [smem:[#allocation2 + $0x6]]  ;;  %v137_v9 = vunpack.c.0.s8 %v136_v2 }
  0x20   :  { %s638_s9 = sld [smem:[#allocation2 + $0x7]]  ;;  %s645_s12 = sld [smem:[#allocation2 + $0x8]] }
  0x21   :  { %s647_s13 = sld [smem:[#allocation2 + $0x9]]  ;;  %s649_s14 = sld [smem:[#allocation2 + $0xa]]  ;;  %v678_v24 = vsub.s32 %v137_v9, %v139_v4 }
  0x22   :  { %s651_s15 = sld [smem:[#allocation2 + $0xb]]  ;;  %v52_v7 = vstv %s632_s1  ;;  %v55_v8 = vstv %s473_s28  ;;  %s660_s2 = sld [smem:[#allocation2 + $0xc]] }
  0x23   :  { %v50_v6 = vstv %s49_s27  ;;  %v56_v11 = vmul.f32 %v55_v8, %v643_v3  ;;  %v63_v12 = vstv %s475_s29  ;;  %s664_s18 = sld [smem:[#allocation4 + $0x1]]  ;;  %s666_s19 = sld [smem:[#allocation2 + $0xd]] }
  0x24   :  { %v51_v10 = vmul.f32 %v50_v6, %v643_v3  ;;  %v71_v13 = vstv %s477_s30  ;;  %v64_v14 = vmul.f32 %v63_v12, %v643_v3  ;;  %v79_v19 = vstv %s634_s6  ;;  %s672_s3 = sld [smem:[#allocation2 + $0xe]]  ;;  %s674_s20 = sld [smem:[#allocation2 + $0xf]] }
  0x25   :  { %v72_v15 = vmul.f32 %v71_v13, %v643_v3  ;;  %v83_v16 = vstv %s480_s7  ;;  %v474_v18 = vrot.slane %v56_v11, 9  ;;  %v91_v22 = vstv %s636_s8  ;;  %s680_s21 = sld [smem:[#allocation2 + $0x10]]  ;;  %s689_s24 = sld [smem:[#allocation2 + $0x11]] }
  0x26   :  { %v53_v17 = vadd.f32 %v52_v7, %v51_v10  ;;  %v84_v20 = vmul.f32 %v83_v16, %v657_v5  ;;  %v476_v21 = vrot.slane %v64_v14, 10  ;;  %v99_v23 = vstv %s638_s9  ;;  %s691_s25 = sld [smem:[#allocation2 + $0x12]]  ;;  %s698_s4 = sld [smem:[#allocation2 + $0x13]] }
  0x27   :  { %v478_v27 = vrot.slane %v72_v15, 11  ;;  %v92_v28 = vmul.f32 %v91_v22, %v657_v5  ;;  %v100_v29 = vmul.f32 %v99_v23, %v657_v5  ;;  %v80_v30 = vmul.f32 %v79_v19, %v657_v5  ;;  %s700_s26 = sld [smem:[#allocation2 + $0x14]]  ;;  %s712_s0 = sld [smem:[#allocation2 + $0x15]] }
  0x28   :  { %v61_v26 = vadd.f32 %v474_v18, %v53_v17  ;;  %v481_v31 = vrot.slane %v84_v20, 9  ;;  %v111_v32 = vstv %s647_s13  ;;  %v119_v33 = vstv %s649_s14  ;;  %s714_s1 = sld [smem:[#allocation2 + $0x16]]  ;;  %s724_s27 = sld [smem:[#allocation2 + $0x18]] }
  0x29   :  { %v483_v35 = vrot.slane %v92_v28, 10  ;;  %v107_v36 = vstv %s645_s12  ;;  %v127_v37 = vstv %s651_s15  ;;  %v485_v38 = vrot.slane %v100_v29, 11  ;;  %s729_s28 = sld [smem:[#allocation2 + $0x17]]  ;;  %s731_s29 = sld [smem:[#allocation4 + $0x2]] }
  0x2a   :  { %v69_v34 = vadd.f32 %v476_v21, %v61_v26  ;;  %v703_v39 = vmul.f32 %v111_v32, %v685_v25  ;;  %v706_v40 = vmul.f32 %v119_v33, %v685_v25  ;;  %v157_v41 = vstv %s660_s2  ;;  %s736_s30 = sld [smem:[#allocation2 + $0x19]]  ;;  %s738_s6 = sld [smem:[#allocation2 + $0x1a]] }
  0x2b   :  { %v158_v43 = vmul.f32 %v157_v41, %v643_v3  ;;  %v159_v44 = vstv %s664_s18  ;;  %v162_v45 = vstv %s666_s19  ;;  %v108_v46 = vmul.f32 %v107_v36, %v685_v25  ;;  %s744_s7 = sld [smem:[#allocation2 + $0x1b]]  ;;  %s746_s8 = sld [smem:[#allocation2 + $0x1c]] }
  0x2c   :  { %v77_v42 = vadd.f32 %v478_v27, %v69_v34  ;;  %v488_v47 = vrot.slane %v703_v39, 9  ;;  %v719_v48 = vmul.f32 %v127_v37, %v685_v25  ;;  %v163_v49 = vmul.f32 %v162_v45, %v643_v3  ;;  %s753_s9 = sld [smem:[#allocation2 + $0x1d]]  ;;  %s755_s10 = sld [smem:[#allocation2 + $0x1e]] }
  0x2d   :  { %v160_v51 = vadd.f32 %v159_v44, %v158_v43  ;;  %v170_v52 = vstv %s672_s3  ;;  %v178_v53 = vstv %s674_s20  ;;  %v490_v54 = vrot.slane %v706_v40, 10  ;;  %s763_s11 = sld [smem:[#allocation2 + $0x1f]]  ;;  %s772_s12 = sld [smem:[#allocation2 + $0x20]] }
  0x2e   :  { %v81_v50 = vadd.f32 %v80_v30, %v77_v42  ;;  %v496_v55 = vrot.slane %v163_v49, 9  ;;  %v171_v56 = vmul.f32 %v170_v52, %v643_v3  ;;  %v179_v57 = vmul.f32 %v178_v53, %v643_v3  ;;  %s777_s13 = sld [smem:[#allocation2 + $0x21]]  ;;  %s784_s14 = sld [smem:[#allocation2 + $0x22]] }
  0x2f   :  { %v186_v59 = vstv %s680_s21  ;;  %v190_v60 = vstv %s689_s24  ;;  %v198_v61 = vstv %s691_s25  ;;  %v206_v7 = vstv %s698_s4  ;;  %s786_s15 = sld [smem:[#allocation2 + $0x24]]  ;;  %s789_s16 = sld [smem:[#allocation2 + $0x23]] }
  0x30   :  { %v89_v58 = vadd.f32 %v481_v31, %v81_v50  ;;  %v168_v62 = vadd.f32 %v496_v55, %v160_v51  ;;  %v498_v63 = vrot.slane %v171_v56, 10  ;;  %v500_v1 = vrot.slane %v179_v57, 11  ;;  %s791_s17 = sld [smem:[#allocation4 + $0x3]]  ;;  %s796_s2 = sld [smem:[#allocation2 + $0x25]] }
  0x31   :  { %v191_v2 = vmul.f32 %v190_v60, %v657_v5  ;;  %v199_v6 = vmul.f32 %v198_v61, %v657_v5  ;;  %v214_v8 = vstv %s700_s26  ;;  %v492_v9 = vrot.slane %v719_v48, 11  ;;  %s798_s18 = sld [smem:[#allocation2 + $0x26]]  ;;  %s805_s19 = sld [smem:[#allocation2 + $0x27]] }
  0x32   :  { %v97_v4 = vadd.f32 %v483_v35, %v89_v58  ;;  %v176_v10 = vadd.f32 %v498_v63, %v168_v62  ;;  %v187_v11 = vmul.f32 %v186_v59, %v657_v5  ;;  %v207_v12 = vmul.f32 %v206_v7, %v657_v5  ;;  %s809_s3 = sld [smem:[#allocation2 + $0x28]]  ;;  %s813_s20 = sld [smem:[#allocation2 + $0x29]] }
  0x33   :  { %v503_v14 = vrot.slane %v191_v2, 9  ;;  %v218_v15 = vstv %s712_s0  ;;  %v226_v16 = vstv %s714_s1  ;;  %v215_v18 = vmul.f32 %v214_v8, %v685_v25  ;;  %s815_s21 = sld [smem:[#allocation2 + $0x2a]]  ;;  %s826_s24 = sld [smem:[#allocation2 + $0x2b]] }
  0x34   :  { %v105_v13 = vadd.f32 %v485_v38, %v97_v4  ;;  %v184_v17 = vadd.f32 %v500_v1, %v176_v10  ;;  %v219_v19 = vmul.f32 %v218_v15, %v685_v25  ;;  %v760_v20 = vmul.f32 %v226_v16, %v685_v25  ;;  %s838_s25 = sld [smem:[#allocation2 + $0x2d]]  ;;  %s845_s4 = sld [smem:[#allocation2 + $0x2c]] }
  0x35   :  { %v505_v22 = vrot.slane %v199_v6, 10  ;;  %v507_v23 = vrot.slane %v207_v12, 11  ;;  %v261_v26 = vstv %s724_s27  ;;  %v234_v30 = vstv %s729_s28  ;;  %s847_s26 = sld [smem:[#allocation2 + $0x2e]]  ;;  %s559_s0 = sld [smem:[#allocation2 + $0x2f]] }
  0x36   :  { %v109_v21 = vadd.f32 %v108_v46, %v105_v13  ;;  %v188_v28 = vadd.f32 %v187_v11, %v184_v17  ;;  %v510_v29 = vrot.slane %v219_v19, 9  ;;  %v263_v31 = vstv %s731_s29 }
  0x37   :  { %v262_v33 = vmul.f32 %v261_v26, %v643_v3  ;;  %v266_v34 = vstv %s736_s30  ;;  %v274_v35 = vstv %s738_s6  ;;  %v512_v0 = vrot.slane %v760_v20, 10 }
  0x38   :  { %v117_v32 = vadd.f32 %v488_v47, %v109_v21  ;;  %v196_v36 = vadd.f32 %v503_v14, %v188_v28  ;;  %v267_v37 = vmul.f32 %v266_v34, %v643_v3  ;;  %v275_v38 = vmul.f32 %v274_v35, %v643_v3 }
  0x39   :  { %v264_v40 = vadd.f32 %v263_v31, %v262_v33  ;;  %v282_v41 = vstv %s744_s7  ;;  %v290_v42 = vstv %s746_s8  ;;  %v235_v48 = vmul.f32 %v234_v30, %v685_v25 }
  0x3a   :  { %v125_v39 = vadd.f32 %v490_v54, %v117_v32  ;;  %v204_v43 = vadd.f32 %v505_v22, %v196_v36  ;;  %v519_v44 = vrot.slane %v267_v37, 9  ;;  %v521_v45 = vrot.slane %v275_v38, 10 }
  0x3b   :  { %v283_v46 = vmul.f32 %v282_v41, %v643_v3  ;;  %v294_v49 = vstv %s753_s9  ;;  %v302_v50 = vstv %s755_s10  ;;  %v291_v56 = vmul.f32 %v290_v42, %v657_v5 }
  0x3c   :  { %v133_v47 = vadd.f32 %v492_v9, %v125_v39  ;;  %v212_v51 = vadd.f32 %v507_v23, %v204_v43  ;;  %v272_v52 = vadd.f32 %v519_v44, %v264_v40  ;;  %v295_v54 = vmul.f32 %v294_v49, %v657_v5 }
  0x3d   :  { %v523_v53 = vrot.slane %v283_v46, 11  ;;  %v303_v57 = vmul.f32 %v302_v50, %v657_v5  ;;  %v310_v58 = vstv %s763_s11  ;;  %v318_v62 = vstv %s772_s12 }
  0x3e   :  { %v141_v55 = vrot.slane %v133_v47, %v678_v24  ;;  %v216_v59 = vadd.f32 %v215_v18, %v212_v51  ;;  %v280_v60 = vadd.f32 %v521_v45, %v272_v52  ;;  %v311_v61 = vmul.f32 %v310_v58, %v657_v5 }
  0x3f   :  { %v514_v1 = vrot.slane %v235_v48, 11  ;;  %v526_v2 = vrot.slane %v295_v54, 9  ;;  %v322_v4 = vstv %s777_s13  ;;  %v528_v8 = vrot.slane %v303_v57, 10 }
  0x40   :  { %v148_v63 = vrot.slane %v141_v55, %v678_v24  ;;  %v224_v6 = vadd.f32 %v510_v29, %v216_v59  ;;  %v288_v7 = vadd.f32 %v523_v53, %v280_v60  ;;  %v323_v9 = vmul.f32 %v322_v4, %v685_v25 }
  0x41   :  { %v530_v10 = vrot.slane %v311_v61, 11  ;;  %v319_v11 = vmul.f32 %v318_v62, %v685_v25  ;;  %v330_v12 = vstv %s784_s14  ;;  %v365_v13 = vstv %s786_s15 }
  0x42   :  { %154 = vst.msk [vmem:[%s886_s5] ss:$4 sm:$0x3] %vm766_vm0, %v148_v63  ;;  %v232_v14 = vadd.f32 %v512_v0, %v224_v6  ;;  %v292_v15 = vadd.f32 %v291_v56, %v288_v7  ;;  %v338_v16 = vstv %s789_s16  ;;  %v367_v17 = vstv %s791_s17 }
  0x43   :  { %v533_v18 = vrot.slane %v323_v9, 9  ;;  %v366_v19 = vmul.f32 %v365_v13, %v643_v3  ;;  %v370_v20 = vstv %s796_s2  ;;  %v378_v21 = vstv %s798_s18 }
  0x44   :  { %v240_v22 = vadd.f32 %v514_v1, %v232_v14  ;;  %v300_v23 = vadd.f32 %v526_v2, %v292_v15  ;;  %v331_v26 = vmul.f32 %v330_v12, %v685_v25  ;;  %v371_v28 = vmul.f32 %v370_v20, %v643_v3 }
  0x45   :  { %v339_v29 = vmul.f32 %v338_v16, %v685_v25  ;;  %v368_v30 = vadd.f32 %v367_v17, %v366_v19  ;;  %v379_v31 = vmul.f32 %v378_v21, %v643_v3  ;;  %v386_v32 = vstv %s805_s19 }
  0x46   :  { %v248_v33 = vrot.slane %v240_v22, %v678_v24  ;;  %v308_v34 = vadd.f32 %v528_v8, %v300_v23  ;;  %v542_v35 = vrot.slane %v371_v28, 9  ;;  %v387_v36 = vmul.f32 %v386_v32, %v643_v3 }
  0x47   :  { %v544_v0 = vrot.slane %v379_v31, 10  ;;  %v394_v37 = vstv %s809_s3  ;;  %v398_v38 = vstv %s813_s20  ;;  %v406_v39 = vstv %s815_s21 }
  0x48   :  { %v255_v40 = vrot.slane %v248_v33, %v678_v24  ;;  %v316_v41 = vadd.f32 %v530_v10, %v308_v34  ;;  %v376_v42 = vadd.f32 %v542_v35, %v368_v30  ;;  %v546_v43 = vrot.slane %v387_v36, 11 }
  0x49   :  { %v535_v44 = vrot.slane %v331_v26, 10  ;;  %v399_v45 = vmul.f32 %v398_v38, %v657_v5  ;;  %v414_v46 = vstv %s826_s24  ;;  %v395_v48 = vmul.f32 %v394_v37, %v657_v5 }
  0x4a   :  { %515 = vst.msk [vmem:[%s886_s5 + $0x1] ss:$4 sm:$0x3] %vm766_vm0, %v255_v40  ;;  %v320_v3 = vadd.f32 %v319_v11, %v316_v41  ;;  %v384_v47 = vadd.f32 %v544_v0, %v376_v42  ;;  %v407_v49 = vmul.f32 %v406_v39, %v657_v5  ;;  %v537_v50 = vrot.slane %v339_v29, 11 }
  0x4b   :  { %v549_v53 = vrot.slane %v399_v45, 9  ;;  %v415_v54 = vmul.f32 %v414_v46, %v657_v5  ;;  %v426_v55 = vstv %s838_s25  ;;  %v422_v59 = vstv %s845_s4 }
  0x4c   :  { %v328_v51 = vadd.f32 %v533_v18, %v320_v3  ;;  %v392_v52 = vadd.f32 %v546_v43, %v384_v47  ;;  %v551_v58 = vrot.slane %v407_v49, 10  ;;  %v434_v60 = vstv %s847_s26 }
  0x4d   :  { %v553_v63 = vrot.slane %v415_v54, 11  ;;  %v427_v1 = vmul.f32 %v426_v55, %v685_v25  ;;  %v442_v2 = vstv %s559_s0  ;;  %v423_v7 = vmul.f32 %v422_v59, %v685_v25 }
  0x4e   :  { %v336_v56 = vadd.f32 %v535_v44, %v328_v51  ;;  %v396_v57 = vadd.f32 %v395_v48, %v392_v52  ;;  %v435_v8 = vmul.f32 %v434_v60, %v685_v25  ;;  %v443_v11 = vmul.f32 %v442_v2, %v685_v25 }
  0x4f   :  { %v556_v10 = vrot.slane %v427_v1, 9 }
  0x50   :  { %v344_v61 = vadd.f32 %v537_v50, %v336_v56  ;;  %v404_v62 = vadd.f32 %v549_v53, %v396_v57  ;;  %v558_v13 = vrot.slane %v435_v8, 10  ;;  %v560_v15 = vrot.slane %v443_v11, 11 }
  0x52   :  { %v352_v4 = vrot.slane %v344_v61, %v678_v24  ;;  %v412_v6 = vadd.f32 %v551_v58, %v404_v62 }
  0x54   :  { %v359_v5 = vrot.slane %v352_v4, %v678_v24  ;;  %v420_v9 = vadd.f32 %v553_v63, %v412_v6 }
  0x56   :  { %538 = vst.msk [vmem:[%s886_s5 + $0x2] ss:$4 sm:$0x3] %vm766_vm0, %v359_v5  ;;  %v424_v12 = vadd.f32 %v423_v7, %v420_v9 }
  0x58   :  { %v432_v14 = vadd.f32 %v556_v10, %v424_v12 }
  0x5a   :  { %v440_v16 = vadd.f32 %v558_v13, %v432_v14 }
  0x5c   :  { %v448_v17 = vadd.f32 %v560_v15, %v440_v16 }
  0x5e   :  { %v456_v18 = vrot.slane %v448_v17, %v678_v24 }
  0x60   :  { %v463_v19 = vrot.slane %v456_v18, %v678_v24 }
  0x62   :  { %561 = vst.msk [vmem:[%s886_s5 + $0x3] ss:$4 sm:$0x3] %vm766_vm0, %v463_v19 }
  0x63   :  { %471 = vsyncpa [#allocation3], 1 }
  0x64   :  { %472 = vsyncpa [#allocation5], 1 }

</bundles_post_ra>
